<compile_context>
chip_gen: v5e
topology: v5e:2x2
jax: 0.10.0
libtpu: 0.0.40
codegen_flags: <defaults>
</compile_context>

<pallas_src>
import jax
import jax.numpy as jnp
from jax.experimental import pallas as pl
from jax.experimental.pallas import tpu as pltpu


def _mean_pool_kernel(h_ref, m_ref, o_ref, acc_ref, cnt_ref):
    # h_ref:   (TB, TS, H) tile of last_hidden_state
    # m_ref:   (TB, TS)    tile of attention_mask (original dtype, cast here)
    # o_ref:   (TB, H)     output tile (written on the last seq step)
    # acc_ref: (TB, H) f32 running masked sum
    # cnt_ref: (TB, 1) f32 running mask count
    s = pl.program_id(1)

    @pl.when(s == 0)
    def _init():
        acc_ref[...] = jnp.zeros_like(acc_ref)
        cnt_ref[...] = jnp.zeros_like(cnt_ref)

    h = h_ref[...].astype(jnp.float32)            # (TB, TS, H)
    m = m_ref[...].astype(jnp.float32)            # (TB, TS)
    acc_ref[...] += jnp.sum(h * m[:, :, None], axis=1)       # (TB, H)
    cnt_ref[...] += jnp.sum(m, axis=1, keepdims=True)        # (TB, 1)

    @pl.when(s == pl.num_programs(1) - 1)
    def _finalize():
        denom = jnp.maximum(cnt_ref[...], 1e-9)   # torch.clamp(min=1e-9)
        inv = pl.reciprocal(denom, approx=True)   # EUP slot, frees the VALU
        o_ref[...] = (acc_ref[...] * inv).astype(o_ref.dtype)


def mean_pooling(last_hidden_state, attention_mask):
    """Pallas implementation of MeanPooling.forward.

    last_hidden_state: [B, S, H] float array
    attention_mask:    [B, S]    any numeric dtype (kept narrow in HBM)
    returns:           [B, H]    float32
    """
    B, S, H = last_hidden_state.shape
    assert attention_mask.shape == (B, S)

    dtype_bytes = jnp.dtype(last_hidden_state.dtype).itemsize
    # Batch rows per grid step: sublane-dense I/O (8 f32 rows / 16 bf16 rows).
    tb = 16 if dtype_bytes == 2 else 8

    # Sequence tile: keep each hidden-state buffer <= ~8 MiB (double-buffered
    # -> ~16 MiB), safe for v7x's 64 MiB VMEM and v5e's small scoped default.
    per_buf_budget = 8 * 1024 * 1024
    ts_cap = max(128, per_buf_budget // (tb * H * dtype_bytes))
    if S <= ts_cap:
        ts = S                                    # whole sequence in one tile
    else:
        ts = min(ts_cap, 512)
        ts = max(128, (ts // 128) * 128)          # multiple of 128: dense tiles

    # Pad batch / sequence to tile multiples with zeros. Zero-padded mask
    # rows/columns contribute nothing to either sum, so results are exact;
    # padded batch rows are sliced off below.
    b_pad = -B % tb
    s_pad = -S % ts
    if b_pad or s_pad:
        last_hidden_state = jnp.pad(
            last_hidden_state, ((0, b_pad), (0, s_pad), (0, 0)))
        attention_mask = jnp.pad(attention_mask, ((0, b_pad), (0, s_pad)))
    Bp, Sp = B + b_pad, S + s_pad

    out = pl.pallas_call(
        _mean_pool_kernel,
        out_shape=jax.ShapeDtypeStruct((Bp, H), jnp.float32),
        grid_spec=pltpu.PrefetchScalarGridSpec(
            num_scalar_prefetch=0,
            grid=(Bp // tb, Sp // ts),            # batch (parallel), seq (reduction, last)
            in_specs=[
                pl.BlockSpec((tb, ts, H), lambda b, s: (b, s, 0)),
                pl.BlockSpec((tb, ts), lambda b, s: (b, s)),
            ],
            out_specs=pl.BlockSpec((tb, H), lambda b, s: (b, 0)),
            scratch_shapes=[
                pltpu.VMEM((tb, H), jnp.float32),   # masked-sum accumulator
                pltpu.VMEM((tb, 1), jnp.float32),   # mask-count accumulator
            ],
        ),
        compiler_params=pltpu.CompilerParams(
            dimension_semantics=("parallel", "arbitrary"),
            vmem_limit_bytes=32 * 1024 * 1024,
        ),
    )(last_hidden_state, attention_mask)          # mask kept in original dtype

    return out[:B]


def _reference(last_hidden_state, attention_mask):
    mask = attention_mask[:, :, None].astype(jnp.float32)
    h = last_hidden_state.astype(jnp.float32)
    sum_emb = jnp.sum(h * mask, axis=1)
    sum_mask = jnp.maximum(jnp.sum(mask, axis=1), 1e-9)
    return sum_emb / sum_mask


if __name__ == "__main__":
    B, S, H = 2, 8, 32
    key = jax.random.PRNGKey(0)
    k_h, k_m = jax.random.split(key)

    last_hidden_state = jax.random.normal(k_h, (B, S, H), dtype=jnp.float32)
    # Binary attention mask with a few padded (zero) positions.
    attention_mask = (jax.random.uniform(k_m, (B, S)) > 0.3).astype(jnp.int32)

    out = mean_pooling(last_hidden_state, attention_mask)
    out = jax.block_until_ready(out)

    ref = _reference(last_hidden_state, attention_mask)
    assert out.shape == (B, H)
    # Tolerance covers the low-precision EUP reciprocal (approx=True).
    assert jnp.allclose(out, ref, atol=2e-3, rtol=2e-3)

    print("KERNEL_OK")
</pallas_src>

<mosaic_0001>
module attributes {stable_mosaic.version = 11 : i64} {
  func.func @_mean_pool_kernel(%arg0: i32, %arg1: i32, %arg2: memref<8x8x32xf32, #tpu.memory_space<vmem>>, %arg3: memref<8x8xi32, #tpu.memory_space<vmem>>, %arg4: memref<8x32xf32, #tpu.memory_space<vmem>>, %arg5: memref<8x32xf32, #tpu.memory_space<vmem>>, %arg6: memref<8x1xf32, #tpu.memory_space<vmem>>) attributes {dimension_semantics = [#tpu.dimension_semantics<parallel>, #tpu.dimension_semantics<arbitrary>], iteration_bounds = array<i64: 1, 1>, scalar_prefetch = 0 : i64, scratch_operands = 2 : i64, tpu.core_type = #tpu.core_type<tc>, window_params = [{transform_indices = @transform_0, window_bounds = array<i64: 8, 8, 32>}, {transform_indices = @transform_1, window_bounds = array<i64: 8, 8>}, {transform_indices = @transform_2, window_bounds = array<i64: 8, 32>}]} {
    %c0_i32 = arith.constant 0 : i32
    %0 = arith.cmpi eq, %arg1, %c0_i32 : i32
    %1 = arith.extui %0 : i1 to i32
    %c0_i32_0 = arith.constant 0 : i32
    %2 = arith.cmpi ne, %1, %c0_i32_0 : i32
    scf.if %2 {
      %cst_16 = arith.constant 0.000000e+00 : f32
      %21 = vector.broadcast %cst_16 : f32 to vector<8x32xf32>
      %c0_17 = arith.constant 0 : index
      %c0_18 = arith.constant 0 : index
      %22 = vector.load %arg5[%c0_17, %c0_18] : memref<8x32xf32, #tpu.memory_space<vmem>>, vector<8x32xf32>
      tpu.vector_store %arg5[%c0_17, %c0_18], %21 {strides = array<i32>} : memref<8x32xf32, #tpu.memory_space<vmem>>, vector<8x32xf32>,
      %cst_19 = arith.constant 0.000000e+00 : f32
      %23 = vector.broadcast %cst_19 : f32 to vector<8x1xf32>
      %c0_20 = arith.constant 0 : index
      %c0_21 = arith.constant 0 : index
      %24 = vector.load %arg6[%c0_20, %c0_21] : memref<8x1xf32, #tpu.memory_space<vmem>>, vector<8x1xf32>
      tpu.vector_store %arg6[%c0_20, %c0_21], %23 {strides = array<i32>} : memref<8x1xf32, #tpu.memory_space<vmem>>, vector<8x1xf32>,
    } else {
    }
    %c0 = arith.constant 0 : index
    %c0_1 = arith.constant 0 : index
    %c0_2 = arith.constant 0 : index
    %3 = vector.load %arg2[%c0, %c0_1, %c0_2] : memref<8x8x32xf32, #tpu.memory_space<vmem>>, vector<8x8x32xf32>
    %c0_3 = arith.constant 0 : index
    %c0_4 = arith.constant 0 : index
    %4 = vector.load %arg3[%c0_3, %c0_4] : memref<8x8xi32, #tpu.memory_space<vmem>>, vector<8x8xi32>
    %5 = arith.sitofp %4 : vector<8x8xi32> to vector<8x8xf32>
    %c0_5 = arith.constant 0 : index
    %c0_6 = arith.constant 0 : index
    %6 = vector.load %arg5[%c0_5, %c0_6] : memref<8x32xf32, #tpu.memory_space<vmem>>, vector<8x32xf32>
    %7 = vector.shape_cast %5 : vector<8x8xf32> to vector<8x8x1xf32>
    %8 = vector.broadcast %7 : vector<8x8x1xf32> to vector<8x8x32xf32>
    %9 = arith.mulf %3, %8 : vector<8x8x32xf32>
    %cst = arith.constant dense<0.000000e+00> : vector<8x32xf32>
    %10 = vector.multi_reduction <add>, %9, %cst [1] : vector<8x8x32xf32> to vector<8x32xf32>
    %11 = arith.addf %6, %10 : vector<8x32xf32>
    %c0_7 = arith.constant 0 : index
    %c0_8 = arith.constant 0 : index
    %12 = vector.load %arg5[%c0_7, %c0_8] : memref<8x32xf32, #tpu.memory_space<vmem>>, vector<8x32xf32>
    tpu.vector_store %arg5[%c0_7, %c0_8], %11 {strides = array<i32>} : memref<8x32xf32, #tpu.memory_space<vmem>>, vector<8x32xf32>,
    %c0_9 = arith.constant 0 : index
    %c0_10 = arith.constant 0 : index
    %13 = vector.load %arg6[%c0_9, %c0_10] : memref<8x1xf32, #tpu.memory_space<vmem>>, vector<8x1xf32>
    %cst_11 = arith.constant dense<0.000000e+00> : vector<8xf32>
    %14 = vector.multi_reduction <add>, %5, %cst_11 [1] : vector<8x8xf32> to vector<8xf32>
    %15 = vector.shape_cast %14 : vector<8xf32> to vector<8x1xf32>
    %16 = arith.addf %13, %15 : vector<8x1xf32>
    %c0_12 = arith.constant 0 : index
    %c0_13 = arith.constant 0 : index
    %17 = vector.load %arg6[%c0_12, %c0_13] : memref<8x1xf32, #tpu.memory_space<vmem>>, vector<8x1xf32>
    tpu.vector_store %arg6[%c0_12, %c0_13], %16 {strides = array<i32>} : memref<8x1xf32, #tpu.memory_space<vmem>>, vector<8x1xf32>,
    %c0_i32_14 = arith.constant 0 : i32
    %18 = arith.cmpi eq, %arg1, %c0_i32_14 : i32
    %19 = arith.extui %18 : i1 to i32
    %c0_i32_15 = arith.constant 0 : i32
    %20 = arith.cmpi ne, %19, %c0_i32_15 : i32
    scf.if %20 {
      %c0_16 = arith.constant 0 : index
      %c0_17 = arith.constant 0 : index
      %21 = vector.load %arg6[%c0_16, %c0_17] : memref<8x1xf32, #tpu.memory_space<vmem>>, vector<8x1xf32>
      %cst_18 = arith.constant 9.99999971E-10 : f32
      %22 = vector.broadcast %cst_18 : f32 to vector<8x1xf32>
      %23 = arith.maximumf %21, %22 : vector<8x1xf32>
      %24 = tpu.reciprocal %23 {approx = true} : vector<8x1xf32> -> vector<8x1xf32>
      %c0_19 = arith.constant 0 : index
      %c0_20 = arith.constant 0 : index
      %25 = vector.load %arg5[%c0_19, %c0_20] : memref<8x32xf32, #tpu.memory_space<vmem>>, vector<8x32xf32>
      %26 = vector.broadcast %24 : vector<8x1xf32> to vector<8x32xf32>
      %27 = arith.mulf %25, %26 : vector<8x32xf32>
      %c0_21 = arith.constant 0 : index
      %c0_22 = arith.constant 0 : index
      %28 = vector.load %arg4[%c0_21, %c0_22] : memref<8x32xf32, #tpu.memory_space<vmem>>, vector<8x32xf32>
      tpu.vector_store %arg4[%c0_21, %c0_22], %27 {strides = array<i32>} : memref<8x32xf32, #tpu.memory_space<vmem>>, vector<8x32xf32>,
    } else {
    }
    return
  }
  func.func @transform_0(%arg0: i32, %arg1: i32) -> (i32, i32, i32) {
    %c0_i32 = arith.constant 0 : i32
    %c0_i32_0 = arith.constant 0 : i32
    return %arg0, %arg1, %c0_i32 : i32, i32, i32
  }
  func.func @transform_1(%arg0: i32, %arg1: i32) -> (i32, i32) {
    %c0_i32 = arith.constant 0 : i32
    return %arg0, %arg1 : i32, i32
  }
  func.func @transform_2(%arg0: i32, %arg1: i32) -> (i32, i32) {
    %c0_i32 = arith.constant 0 : i32
    %c0_i32_0 = arith.constant 0 : i32
    return %arg0, %c0_i32 : i32, i32
  }
}

</mosaic_0001>

<bundles_post_ra>
// kernel: tpu_custom_call.1
= control target key start
LH: loop header
LB: loop body
LE: loop exit
PB: predicated region body
PF: predicated region fallthrough
CT: control target
= control target key end

     0   :  { %7 = vsyncpa [#allocation5], 0  ;;  %s383_s0 = inlined_call_operand.hbm [shape: f32[8,8,32], index: 0, kind: input, shape index: {}]   ;;  %s384_s1 = inlined_call_operand.hbm [shape: s32[8,8], index: 1, kind: input, shape index: {}]   ;;  %s385_s2 = inlined_call_operand.hbm [shape: f32[8,32], index: 2, kind: output, shape index: {}]  }
   0x1   :  { %8 = vsyncpa [#allocation8], 0 }
   0x2   :  { %9 = vsyncpa [#allocation6], 0  ;;  %s14_s11 = sshll.u32 %s383_s0, 4  ;;  %s339_s12 = smov [#allocation4]   ;;  %s15_s11 = int_to_ptr.hbm [resolvable:$true] %s14_s11 }
   0x3   :  { %s16_s13 = sshll.u32 %s339_s12, 4  ;;  %s28_s16 = sshll.u32 %s384_s1, 4  ;;  %s17_s13 = int_to_ptr.vmem [resolvable:$true] %s16_s13  ;;  %s29_s16 = int_to_ptr.hbm [resolvable:$true] %s28_s16 }
   0x4   :  { %s340_s17 = smov 128   ;;  %s341_s18 = smov 8  }
   0x5   :  { %22 = dma.hbm_to_vmem [thread:$0]  %s15_s11, 1024, %s17_s13, [#allocation5], %s340_s17, %s340_s17, %s341_s18  }
   0x6   :  { %s342_s19 = smov [#allocation7]  }
   0x7   :  { %s30_s20 = sshll.u32 %s342_s19, 4  ;;  %s31_s20 = int_to_ptr.vmem [resolvable:$true] %s30_s20 }
   0x8   :  { %33 = dma.hbm_to_vmem [thread:$0]  %s29_s16, 128, %s31_s20, [#allocation8]  }
   0x9   :  { %333 = dma.done.wait [#allocation5], 1024  }
   0xa   :  { %334 = vsyncadd [#allocation5], 4294966272 }
   0xb   :  { %335 = dma.done.wait [#allocation8], 128  }
   0xc   :  { %336 = vsyncadd [#allocation8], 4294967168  ;;  %v62_v0 = vlaneseq  ;;  %vm46_vm0 = vcmask 261120   ;;  %vm48_vm1 = vcmask 7168   ;;  %v343_v2 = vmov 0.0   ;;  %v58_v3 = vld [vmem:[#allocation7] sm:$0xff] }
   0xd   :  { %47 = vst.msk [vmem:[#allocation2] sm:$0xff] %vm46_vm0, %v343_v2  ;;  %vm208_vm2 = vcmask 64512   ;;  %v59_v4 = vcvt.s32.f32 %v58_v3  ;;  %v344_v14 = vmov 0   ;;  %v51_v21 = vld [vmem:[#allocation4 + $0x8] sm:$0xff]  ;;  %v53_v22 = vld [vmem:[#allocation4 + $0x18] sm:$0xff]  ;;  %v54_v24 = vld [vmem:[#allocation4 + $0x20] sm:$0xff] }
   0xe   :  { %v63_v1 = vshrl.u32 %v62_v0, 7  ;;  %49 = vst.msk [vmem:[#allocation3] sm:$0xff] %vm48_vm1, %v343_v2  ;;  %v52_v26 = vld [vmem:[#allocation4 + $0x10] sm:$0xff]  ;;  %v55_v44 = vld [vmem:[#allocation4 + $0x28] sm:$0xff]  ;;  %v50_v51 = vld [vmem:[#allocation4] sm:$0xff]  ;;  %vm190_vm3 = vcmask 1041409  }
   0xf   :  { %v209_v5 = vsel %vm208_vm2, %v59_v4, 0.0  ;;  %v68_v6 = vperm.slane %v59_v4, 1  ;;  %v82_v7 = vperm.slane %v59_v4, 3  ;;  %v75_v8 = vperm.slane %v59_v4, 2  ;;  %v56_v28 = vld [vmem:[#allocation4 + $0x30] sm:$0xff]  ;;  %s345_s0 = smov [#allocation9]  }
  0x10   :  { %255 = vset.pattern.permute.xlu1 %v63_v1  ;;  %254 = vset.pattern.permute.xlu0 %v63_v1  ;;  %v89_v9 = vperm.slane %v59_v4, 4  ;;  %v96_v10 = vperm.slane %v59_v4, 5  ;;  %v103_v11 = vperm.slane %v59_v4, 6  ;;  %v61_v12 = vperm.slane %v59_v4, 0  ;;  %s234_s1 = sshll.u32 %s345_s0, 4  ;;  %s236_s23 = sshll.u32 %s385_s2, 4  ;;  %s235_s1 = int_to_ptr.vmem [resolvable:$true] %s234_s1  ;;  %s237_s23 = int_to_ptr.hbm [resolvable:$true] %s236_s23 }
  0x11   :  { %256 = vset.pattern.permute.xlu2 %v63_v1  ;;  %210 = vadd.xlane.f32.xlu0 %v209_v5  ;;  %v110_v13 = vperm.slane %v59_v4, 7  ;;  %v57_v1 = vld [vmem:[#allocation4 + $0x38] sm:$0xff]  ;;  %vm192_vm4 = vcmask 1042434   ;;  %vm194_vm5 = vcmask 1043459   ;;  %vm196_vm6 = vcmask 1044484  }
  0x12   :  { %vm198_vm7 = vcmask 1045509   ;;  %vm200_vm8 = vcmask 1046534   ;;  %vm202_vm9 = vcmask 1047559  }
  0x15   :  { %v207_v17 = vld [vmem:[#allocation3] sm:$0xff] }
  0x18   :  { %73 = vperm.xlu1 %255, %v68_v6  }
  0x19   :  { %87 = vperm.xlu2 %256, %v82_v7  }
  0x20   :  { %80 = vperm.xlu1 %255, %v75_v8  }
  0x21   :  { %94 = vperm.xlu2 %256, %v89_v9  }
  0x25   :  { %66 = vperm.xlu0 %254, %v61_v12  }
  0x28   :  { %101 = vperm.xlu1 %255, %v96_v10  }
  0x29   :  { %108 = vperm.xlu2 %256, %v103_v11  }
  0x2d   :  { %258 = vset.pattern.permute.xlu0 %v344_v14 }
  0x30   :  { %115 = vperm.xlu1 %255, %v110_v13  }
  0x31   :  { %257 = vset.pattern.permute.xlu2 %v344_v14 }
  0x73   :  { %v88_v15 = vpop.permute.xlu2 %87 }
  0x74   :  { %v120_v25 = vmul.f32 %v88_v15, %v53_v22 }
  0x76   :  { %v147_v35 = vsel %vm46_vm0, %v120_v25, 0.0 }
  0x77   :  { %v148_v41 = vrot.slane %v147_v35, 4 }
  0x79   :  { %v149_v49 = vadd.f32 %v148_v41, %v147_v35 }
  0x7b   :  { %v95_v16 = vpop.permute.xlu2 %94  ;;  %v150_v61 = vrot.slane %v149_v49, 2 }
  0x7c   :  { %v121_v29 = vmul.f32 %v95_v16, %v54_v24 }
  0x7d   :  { %v151_v8 = vadd.f32 %v150_v61, %v149_v49 }
  0x7e   :  { %v154_v39 = vsel %vm46_vm0, %v121_v29, 0.0 }
  0x7f   :  { %v155_v43 = vrot.slane %v154_v39, 4 }
  0x81   :  { %v156_v52 = vadd.f32 %v155_v43, %v154_v39 }
  0x83   :  { %v109_v27 = vpop.permute.xlu2 %108  ;;  %v157_v62 = vrot.slane %v156_v52, 2 }
  0x84   :  { %v211_v18 = vpop.xlane.xlu0 %210  ;;  %v123_v33 = vmul.f32 %v109_v27, %v56_v28 }
  0x85   :  { %v212_v20 = vadd.f32 %v211_v18, %v207_v17  ;;  %v158_v11 = vadd.f32 %v157_v62, %v156_v52 }
  0x86   :  { %v168_v42 = vsel %vm46_vm0, %v123_v33, 0.0 }
  0x87   :  { %214 = vst.msk [vmem:[#allocation3] sm:$0xff] %vm48_vm1, %v212_v20  ;;  %v169_v48 = vrot.slane %v168_v42, 4 }
  0x89   :  { %v170_v60 = vadd.f32 %v169_v48, %v168_v42  ;;  %v60_v42 = vld [vmem:[#allocation2] sm:$0xff] }
  0x8a   :  { %v74_v19 = vpop.permute.xlu1 %73 }
  0x8b   :  { %v118_v23 = vmul.f32 %v74_v19, %v51_v21  ;;  %v171_v6 = vrot.slane %v170_v60, 2  ;;  %v152_v19 = vrot.slane %v151_v8, 1  ;;  %v159_v21 = vrot.slane %v158_v11, 1 }
  0x8d   :  { %v133_v30 = vsel %vm46_vm0, %v118_v23, 0.0  ;;  %v172_v17 = vadd.f32 %v171_v6, %v170_v60  ;;  %v153_v29 = vadd.f32 %v152_v19, %v151_v8 }
  0x8e   :  { %v218_v34 = vld [vmem:[#allocation3] sm:$0xff]  ;;  %v134_v37 = vrot.slane %v133_v30, 4 }
  0x8f   :  { %v219_v36 = vmax.f32 %v218_v34, 1e-09  ;;  %v173_v27 = vrot.slane %v172_v17, 1 }
  0x90   :  { %v135_v45 = vadd.f32 %v134_v37, %v133_v30 }
  0x91   :  { %259 = vrcp.f32 %v219_v36  ;;  %v174_v36 = vadd.f32 %v173_v27, %v172_v17 }
  0x92   :  { %v81_v31 = vpop.permute.xlu1 %80  ;;  %v136_v54 = vrot.slane %v135_v45, 2 }
  0x93   :  { %v119_v32 = vmul.f32 %v81_v31, %v52_v26  ;;  %v160_v31 = vadd.f32 %v159_v21, %v158_v11 }
  0x94   :  { %v137_v2 = vadd.f32 %v136_v54, %v135_v45 }
  0x95   :  { %v140_v38 = vsel %vm46_vm0, %v119_v32, 0.0 }
  0x96   :  { %v141_v40 = vrot.slane %v140_v38, 4  ;;  %v138_v12 = vrot.slane %v137_v2, 1 }
  0x97   :  { %v260_v53 = vpop.eup %259  ;;  %v67_v56 = vpop.permute.xlu0 %66 }
  0x98   :  { %v142_v46 = vadd.f32 %v141_v40, %v140_v38  ;;  %224 = vperm.xlu2 %257, %v260_v53   ;;  %v117_v59 = vmul.f32 %v67_v56, %v50_v51  ;;  %v139_v23 = vadd.f32 %v138_v12, %v137_v2 }
  0x9a   :  { %v102_v47 = vpop.permute.xlu1 %101  ;;  %v143_v57 = vrot.slane %v142_v46, 2  ;;  %v126_v0 = vsel %vm46_vm0, %v117_v59, 0.0 }
  0x9b   :  { %v122_v50 = vmul.f32 %v102_v47, %v55_v44  ;;  %v127_v3 = vrot.slane %v126_v0, 4 }
  0x9c   :  { %v144_v4 = vadd.f32 %v143_v57, %v142_v46 }
  0x9d   :  { %v161_v55 = vsel %vm46_vm0, %v122_v50, 0.0  ;;  %v128_v9 = vadd.f32 %v127_v3, %v126_v0 }
  0x9e   :  { %v162_v58 = vrot.slane %v161_v55, 4  ;;  %v145_v16 = vrot.slane %v144_v4, 1 }
  0x9f   :  { %v129_v14 = vrot.slane %v128_v9, 2 }
  0xa0   :  { %v163_v63 = vadd.f32 %v162_v58, %v161_v55  ;;  %v146_v26 = vadd.f32 %v145_v16, %v144_v4 }
  0xa1   :  { %v130_v20 = vadd.f32 %v129_v14, %v128_v9 }
  0xa2   :  { %v164_v5 = vrot.slane %v163_v63, 2  ;;  %v116_v7 = vpop.permute.xlu1 %115 }
  0xa3   :  { %v124_v10 = vmul.f32 %v116_v7, %v57_v1  ;;  %v131_v25 = vrot.slane %v130_v20, 1 }
  0xa4   :  { %v165_v13 = vadd.f32 %v164_v5, %v163_v63 }
  0xa5   :  { %v175_v15 = vsel %vm46_vm0, %v124_v10, 0.0  ;;  %v132_v30 = vadd.f32 %v131_v25, %v130_v20 }
  0xa6   :  { %v176_v18 = vrot.slane %v175_v15, 4  ;;  %v166_v24 = vrot.slane %v165_v13, 1 }
  0xa7   :  { %v191_v34 = vsel %vm190_vm3, %v139_v23, %v132_v30 }
  0xa8   :  { %v177_v22 = vadd.f32 %v176_v18, %v175_v15  ;;  %v167_v33 = vadd.f32 %v166_v24, %v165_v13  ;;  %v193_v35 = vsel %vm192_vm4, %v146_v26, %v191_v34 }
  0xa9   :  { %v195_v38 = vsel %vm194_vm5, %v153_v29, %v193_v35 }
  0xaa   :  { %v178_v28 = vrot.slane %v177_v22, 2  ;;  %v197_v39 = vsel %vm196_vm6, %v160_v31, %v195_v38 }
  0xab   :  { %v199_v41 = vsel %vm198_vm7, %v167_v33, %v197_v39 }
  0xac   :  { %v179_v32 = vadd.f32 %v178_v28, %v177_v22  ;;  %v201_v43 = vsel %vm200_vm8, %v174_v36, %v199_v41 }
  0xae   :  { %v180_v37 = vrot.slane %v179_v32, 1 }
  0xb0   :  { %v181_v40 = vadd.f32 %v180_v37, %v179_v32 }
  0xb2   :  { %v203_v44 = vsel %vm202_vm9, %v181_v40, %v201_v43 }
  0xb3   :  { %v205_v45 = vadd.f32 %v203_v44, %v60_v42 }
  0xb5   :  { %206 = vst.msk [vmem:[#allocation2] sm:$0xff] %vm46_vm0, %v205_v45 }
  0xbc   :  { %v221_v47 = vld [vmem:[#allocation2] sm:$0xff] }
  0xf2   :  { %v225_v46 = vpop.permute.xlu2 %224 }
  0xf3   :  { %v227_v48 = vmul.f32 %v225_v46, %v221_v47 }
  0xf5   :  { %228 = vst.msk [vmem:[#allocation9] sm:$0xff] %vm46_vm0, %v227_v48 }
  0xf6   :  { %239 = dma.vmem_to_hbm [thread:$0]  %s235_s1, 128, %s237_s23, [#allocation6]  }
  0xf7   :  { %337 = dma.done.wait [#allocation6], 128  }
  0xf8   :  { %338 = vsyncadd [#allocation6], 4294967168 }
  0xf9   :  { %244 = vsyncpa [#allocation5], 1 }
  0xfa   :  { %245 = vsyncpa [#allocation8], 1 }
  0xfb   :  { %246 = vsyncpa [#allocation6], 1 }

</bundles_post_ra>
